<compile_context>
chip_gen: v7x
topology: tpu7x:2x2x1
jax: 0.10.0
libtpu: 0.0.40
codegen_flags: <defaults>
</compile_context>

<pallas_src>
import math

import numpy as np
import jax
import jax.numpy as jnp
from jax import lax
from jax import image as jax_image
from jax.experimental import pallas as pl
from jax.experimental.pallas import tpu as pltpu


# ---------------------------------------------------------------------------
# Pallas kernels: fused 1x1 conv (BN-scale folded into weight) + bias + ReLU
# ---------------------------------------------------------------------------

def _conv_bn_relu_mxu_kernel(x_ref, w_ref, b_ref, o_ref):
    # x_ref: (Cin, T) compute dtype; w_ref: (Cout, Cin) compute dtype (scale folded);
    # b_ref: (Cout, 1) f32; o_ref: (Cout, T) output dtype.
    y = jnp.dot(w_ref[...], x_ref[...], preferred_element_type=jnp.float32)
    o_ref[...] = jnp.maximum(y + b_ref[...], 0.0).astype(o_ref.dtype)


def _make_conv_bn_relu_vpu_kernel(cin):
    # For very small Cin the MXU is nearly empty; a VPU broadcast-MAC over the
    # input channels is cheaper and avoids the masked matmul path.
    def kernel(x_ref, w_ref, b_ref, o_ref):
        x = x_ref[...].astype(jnp.float32)           # (Cin, T)
        w = w_ref[...].astype(jnp.float32)           # (Cout, Cin)
        acc = w[:, 0:1] * x[0:1, :]                  # (Cout, T)
        for c in range(1, cin):
            acc = acc + w[:, c:c + 1] * x[c:c + 1, :]
        o_ref[...] = jnp.maximum(acc + b_ref[...], 0.0).astype(o_ref.dtype)
    return kernel


def _round_up(a, b):
    return ((a + b - 1) // b) * b


def _pick_lane_tile(hw, cin, cout, x_bytes, out_bytes,
                    max_tile=2048, vmem_budget=12 * 1024 * 1024):
    """Largest lane tile (multiple of 128, <= max_tile) such that the
    double-buffered x/out tiles + the weight fit a conservative VMEM budget
    (safe on v5e's 16 MiB default scoped VMEM and v7x's 64 MiB physical)."""
    tile = min(max_tile, _round_up(hw, 128))
    tile = max(128, _round_up(tile, 128))

    def live_bytes(t):
        return 2 * t * (cin * x_bytes + cout * out_bytes) + cin * cout * x_bytes

    while tile > 128 and live_bytes(tile) > vmem_budget:
        tile -= 128
    return tile


def conv_bn_relu_1x1(x_nchw, weight, bn_gamma, bn_beta, bn_mean, bn_var,
                     eps=1e-5, compute_dtype=jnp.bfloat16, max_lane_tile=2048):
    """Fused 1x1 Conv2d(bias=False) + BatchNorm2d(eval stats) + ReLU.

    x_nchw: (N, Cin, H, W); weight: (Cout, Cin, 1, 1) -> (N, Cout, H, W)."""
    N, Cin, H, W = x_nchw.shape
    Cout = weight.shape[0]
    HW = H * W
    out_dtype = x_nchw.dtype

    # Fold eval-mode BN into per-output-channel scale/bias; fold the scale into
    # the weight in f32 BEFORE any low-precision cast (avoids double rounding).
    scale = (bn_gamma / jnp.sqrt(bn_var + eps)).astype(jnp.float32)          # (Cout,)
    bias = (bn_beta.astype(jnp.float32) - bn_mean.astype(jnp.float32) * scale)
    w2d = (weight.reshape(Cout, Cin).astype(jnp.float32)
           * scale[:, None]).astype(compute_dtype)                          # (Cout, Cin)
    bias2d = bias.reshape(Cout, 1)                                           # (Cout, 1) f32

    # Channels-first view: (N, Cin, H, W) -> (N, Cin, HW).  No transpose.
    x3 = x_nchw.reshape(N, Cin, HW).astype(compute_dtype)

    x_bytes = np.dtype(compute_dtype).itemsize
    out_bytes = np.dtype(out_dtype).itemsize
    thw = _pick_lane_tile(HW, Cin, Cout, x_bytes, out_bytes, max_tile=max_lane_tile)
    HWp = _round_up(HW, thw)
    if HWp != HW:
        x3 = jnp.pad(x3, ((0, 0), (0, 0), (0, HWp - HW)))

    kernel = (_make_conv_bn_relu_vpu_kernel(Cin) if Cin <= 8
              else _conv_bn_relu_mxu_kernel)

    out3 = pl.pallas_call(
        kernel,
        out_shape=jax.ShapeDtypeStruct((N, Cout, HWp), out_dtype),
        grid_spec=pltpu.PrefetchScalarGridSpec(
            num_scalar_prefetch=0,
            grid=(N, HWp // thw),
            in_specs=[
                pl.BlockSpec((None, Cin, thw), lambda n, t: (n, 0, t)),
                pl.BlockSpec((Cout, Cin), lambda n, t: (0, 0)),
                pl.BlockSpec((Cout, 1), lambda n, t: (0, 0)),
            ],
            out_specs=pl.BlockSpec((None, Cout, thw), lambda n, t: (n, 0, t)),
        ),
        compiler_params=pltpu.CompilerParams(
            dimension_semantics=("parallel", "parallel"),
            vmem_limit_bytes=32 * 1024 * 1024),
    )(x3, w2d, bias2d)

    if HWp != HW:
        out3 = out3[:, :, :HW]
    return out3.reshape(N, Cout, H, W)


# ---------------------------------------------------------------------------
# Pure-JAX pieces of FPEM_v2 (dwconv 3x3, bilinear upsample+add)
# ---------------------------------------------------------------------------

def _dwconv3x3(x, w, stride=1):
    # PyTorch: Conv2d(C, C, 3, stride, padding=1, groups=C, bias=False)
    C = x.shape[1]
    return lax.conv_general_dilated(
        x, w, window_strides=(stride, stride), padding=((1, 1), (1, 1)),
        dimension_numbers=("NCHW", "OIHW", "NCHW"),
        feature_group_count=C)


def _upsample_add(x, y):
    # F.upsample(x, size=y.shape[2:], mode='bilinear') + y   (align_corners=False)
    N, C, H, W = y.shape
    x_up = jax_image.resize(x, (x.shape[0], x.shape[1], H, W), method="bilinear")
    return x_up.astype(y.dtype) + y


def fpem_v2_forward(params, l1, E1, l2, E2, l3, E3, l4,
                    smooth_fn=conv_bn_relu_1x1):
    def smooth(name, x):
        p = params[name]
        return smooth_fn(x, p["w"], p["gamma"], p["beta"], p["mean"], p["var"])

    f1 = _upsample_add(E1, l1)
    f2 = _upsample_add(E2, l2)
    f3 = _upsample_add(E3, l3)
    f4 = l4

    f3_ = smooth("smooth3_1", _dwconv3x3(_upsample_add(f4, f3), params["dwconv3_1"], 1))
    f2_ = smooth("smooth2_1", _dwconv3x3(_upsample_add(f3_, f2), params["dwconv2_1"], 1))
    f1_ = smooth("smooth1_1", _dwconv3x3(_upsample_add(f2_, f1), params["dwconv1_1"], 1))

    f2_ = smooth("smooth2_2", _dwconv3x3(_upsample_add(f2_, f1_), params["dwconv2_2"], 2))
    f3_ = smooth("smooth3_2", _dwconv3x3(_upsample_add(f3_, f2_), params["dwconv3_2"], 2))
    f4_ = smooth("smooth4_2", _dwconv3x3(_upsample_add(f4, f3_), params["dwconv4_2"], 2))

    return (l1 + f1_, E1, l2 + f2_, E2, l3 + f3_, E3, l4 + f4_)


# ---------------------------------------------------------------------------
# Pure-JAX reference for the fused smooth layer (mirrors the kernel math).
# ---------------------------------------------------------------------------

def _conv_bn_relu_1x1_ref(x, w, gamma, beta, mean, var, eps=1e-5,
                          compute_dtype=jnp.bfloat16):
    Cout, Cin = w.shape[0], w.shape[1]
    scale = (gamma / jnp.sqrt(var + eps)).astype(jnp.float32)
    bias = (beta.astype(jnp.float32) - mean.astype(jnp.float32) * scale)
    w2d = (w.reshape(Cout, Cin).astype(jnp.float32)
           * scale[:, None]).astype(compute_dtype)
    xq = x.astype(compute_dtype).astype(jnp.float32)
    y = jnp.einsum("oc,nchw->nohw", w2d.astype(jnp.float32), xq)
    y = y + bias[None, :, None, None]
    return jnp.maximum(y, 0.0).astype(x.dtype)


# ---------------------------------------------------------------------------
# Demo / self-check
# ---------------------------------------------------------------------------

if __name__ == "__main__":
    key = jax.random.PRNGKey(0)
    keys = iter(jax.random.split(key, 40))

    def normal(shape, std=1.0):
        return jax.random.normal(next(keys), shape, dtype=jnp.float32) * std

    # Small FPEM_v2-consistent shapes: planes=4, batch=2, pyramid 16/8/4/2.
    N, planes = 2, 4
    sizes = [(16, 16), (8, 8), (4, 4), (2, 2)]     # l1..l4 spatial sizes

    l1 = normal((N, planes) + sizes[0])
    l2 = normal((N, planes) + sizes[1])
    l3 = normal((N, planes) + sizes[2])
    l4 = normal((N, planes) + sizes[3])
    E1 = normal((N, planes) + sizes[1])            # E_i at half of l_i's resolution
    E2 = normal((N, planes) + sizes[2])
    E3 = normal((N, planes) + sizes[3])

    # Deterministic parameters.  Smooth layers follow the module's init:
    # conv weight ~ Normal(0, sqrt(2/(k*k*out_planes))), BN gamma=1/beta=0 with
    # default running stats (mean=0, var=1).
    params = {}
    for name in ["dwconv3_1", "dwconv2_1", "dwconv1_1",
                 "dwconv2_2", "dwconv3_2", "dwconv4_2"]:
        params[name] = normal((planes, 1, 3, 3), std=0.3)
    smooth_std = math.sqrt(2.0 / (1 * 1 * planes))
    for name in ["smooth3_1", "smooth2_1", "smooth1_1",
                 "smooth2_2", "smooth3_2", "smooth4_2"]:
        params[name] = dict(
            w=normal((planes, planes, 1, 1), std=smooth_std),
            gamma=jnp.ones((planes,), jnp.float32),
            beta=jnp.zeros((planes,), jnp.float32),
            mean=jnp.zeros((planes,), jnp.float32),
            var=jnp.ones((planes,), jnp.float32))

    # ---- Direct kernel check (tight tolerance): tiny-Cin (VPU) path --------
    xs = normal((N, planes) + sizes[0])
    p = params["smooth1_1"]
    out_k = conv_bn_relu_1x1(xs, p["w"], p["gamma"], p["beta"], p["mean"], p["var"])
    out_r = _conv_bn_relu_1x1_ref(xs, p["w"], p["gamma"], p["beta"], p["mean"], p["var"])
    out_k = jax.block_until_ready(out_k)
    assert out_k.shape == out_r.shape
    assert float(jnp.max(jnp.abs(out_k - out_r))) < 1e-4

    # ---- Direct kernel check: realistic channel count (MXU path) -----------
    Cbig = 128
    xb = normal((1, Cbig, 16, 16))
    wb = normal((Cbig, Cbig, 1, 1), std=math.sqrt(2.0 / Cbig))
    ones = jnp.ones((Cbig,), jnp.float32)
    zeros = jnp.zeros((Cbig,), jnp.float32)
    out_kb = conv_bn_relu_1x1(xb, wb, ones, zeros, zeros, ones)
    out_rb = _conv_bn_relu_1x1_ref(xb, wb, ones, zeros, zeros, ones)
    out_kb = jax.block_until_ready(out_kb)
    assert float(jnp.max(jnp.abs(out_kb - out_rb))) < 1e-3

    # ---- Full FPEM_v2 forward ----------------------------------------------
    out = fpem_v2_forward(params, l1, E1, l2, E2, l3, E3, l4)
    out = jax.block_until_ready(out)
    ref = fpem_v2_forward(params, l1, E1, l2, E2, l3, E3, l4,
                          smooth_fn=_conv_bn_relu_1x1_ref)
    ref = jax.block_until_ready(ref)

    assert out[0].shape == (N, planes) + sizes[0]
    assert out[2].shape == (N, planes) + sizes[1]
    assert out[4].shape == (N, planes) + sizes[2]
    assert out[6].shape == (N, planes) + sizes[3]
    max_err = max(float(jnp.max(jnp.abs(a - b))) for a, b in zip(out, ref))
    # bf16 operand rounding is applied identically in kernel and reference;
    # residual differences come only from f32 accumulation order.
    assert max_err < 5e-2, f"max abs error {max_err}"

    print("KERNEL_OK")
</pallas_src>

<mosaic_0001>
module attributes {stable_mosaic.version = 11 : i64} {
  func.func @kernel(%arg0: i32, %arg1: i32, %arg2: memref<1x4x256xbf16, #tpu.memory_space<vmem>>, %arg3: memref<4x4xbf16, #tpu.memory_space<vmem>>, %arg4: memref<4x1xf32, #tpu.memory_space<vmem>>, %arg5: memref<1x4x256xf32, #tpu.memory_space<vmem>>) attributes {dimension_semantics = [#tpu.dimension_semantics<parallel>, #tpu.dimension_semantics<parallel>], iteration_bounds = array<i64: 2, 1>, scalar_prefetch = 0 : i64, scratch_operands = 0 : i64, tpu.core_type = #tpu.core_type<tc>, window_params = [{transform_indices = @transform_0, window_bounds = array<i64: 1, 4, 256>}, {pipeline_mode = #tpu.pipeline_mode<synchronous>, transform_indices = @transform_1, window_bounds = array<i64: 4, 4>}, {pipeline_mode = #tpu.pipeline_mode<synchronous>, transform_indices = @transform_2, window_bounds = array<i64: 4, 1>}, {transform_indices = @transform_3, window_bounds = array<i64: 1, 4, 256>}]} {
    %c0 = arith.constant 0 : index
    %c0_0 = arith.constant 0 : index
    %c0_1 = arith.constant 0 : index
    %0 = vector.load %arg2[%c0, %c0_0, %c0_1] : memref<1x4x256xbf16, #tpu.memory_space<vmem>>, vector<1x4x256xbf16>
    %1 = vector.shape_cast %0 : vector<1x4x256xbf16> to vector<4x256xbf16>
    %2 = arith.extf %1 : vector<4x256xbf16> to vector<4x256xf32>
    %c0_2 = arith.constant 0 : index
    %c0_3 = arith.constant 0 : index
    %3 = vector.load %arg3[%c0_2, %c0_3] : memref<4x4xbf16, #tpu.memory_space<vmem>>, vector<4x4xbf16>
    %4 = arith.extf %3 : vector<4x4xbf16> to vector<4x4xf32>
    %5 = vector.extract_strided_slice %4 {offsets = [0, 0], sizes = [4, 1], strides = [1, 1]} : vector<4x4xf32> to vector<4x1xf32>
    %6 = vector.extract_strided_slice %2 {offsets = [0, 0], sizes = [1, 256], strides = [1, 1]} : vector<4x256xf32> to vector<1x256xf32>
    %7 = vector.broadcast %5 : vector<4x1xf32> to vector<4x256xf32>
    %8 = vector.broadcast %6 : vector<1x256xf32> to vector<4x256xf32>
    %9 = arith.mulf %7, %8 : vector<4x256xf32>
    %10 = vector.extract_strided_slice %4 {offsets = [0, 1], sizes = [4, 1], strides = [1, 1]} : vector<4x4xf32> to vector<4x1xf32>
    %11 = vector.extract_strided_slice %2 {offsets = [1, 0], sizes = [1, 256], strides = [1, 1]} : vector<4x256xf32> to vector<1x256xf32>
    %12 = vector.broadcast %10 : vector<4x1xf32> to vector<4x256xf32>
    %13 = vector.broadcast %11 : vector<1x256xf32> to vector<4x256xf32>
    %14 = arith.mulf %12, %13 : vector<4x256xf32>
    %15 = arith.addf %9, %14 : vector<4x256xf32>
    %16 = vector.extract_strided_slice %4 {offsets = [0, 2], sizes = [4, 1], strides = [1, 1]} : vector<4x4xf32> to vector<4x1xf32>
    %17 = vector.extract_strided_slice %2 {offsets = [2, 0], sizes = [1, 256], strides = [1, 1]} : vector<4x256xf32> to vector<1x256xf32>
    %18 = vector.broadcast %16 : vector<4x1xf32> to vector<4x256xf32>
    %19 = vector.broadcast %17 : vector<1x256xf32> to vector<4x256xf32>
    %20 = arith.mulf %18, %19 : vector<4x256xf32>
    %21 = arith.addf %15, %20 : vector<4x256xf32>
    %22 = vector.extract_strided_slice %4 {offsets = [0, 3], sizes = [4, 1], strides = [1, 1]} : vector<4x4xf32> to vector<4x1xf32>
    %23 = vector.extract_strided_slice %2 {offsets = [3, 0], sizes = [1, 256], strides = [1, 1]} : vector<4x256xf32> to vector<1x256xf32>
    %24 = vector.broadcast %22 : vector<4x1xf32> to vector<4x256xf32>
    %25 = vector.broadcast %23 : vector<1x256xf32> to vector<4x256xf32>
    %26 = arith.mulf %24, %25 : vector<4x256xf32>
    %27 = arith.addf %21, %26 : vector<4x256xf32>
    %c0_4 = arith.constant 0 : index
    %c0_5 = arith.constant 0 : index
    %28 = vector.load %arg4[%c0_4, %c0_5] : memref<4x1xf32, #tpu.memory_space<vmem>>, vector<4x1xf32>
    %29 = vector.broadcast %28 : vector<4x1xf32> to vector<4x256xf32>
    %30 = arith.addf %27, %29 : vector<4x256xf32>
    %cst = arith.constant 0.000000e+00 : f32
    %31 = vector.broadcast %cst : f32 to vector<4x256xf32>
    %32 = arith.maximumf %30, %31 : vector<4x256xf32>
    %c0_6 = arith.constant 0 : index
    %c0_7 = arith.constant 0 : index
    %c0_8 = arith.constant 0 : index
    %33 = vector.load %arg5[%c0_6, %c0_7, %c0_8] : memref<1x4x256xf32, #tpu.memory_space<vmem>>, vector<1x4x256xf32>
    %34 = vector.shape_cast %33 : vector<1x4x256xf32> to vector<4x256xf32>
    %35 = vector.shape_cast %32 : vector<4x256xf32> to vector<1x4x256xf32>
    tpu.vector_store %arg5[%c0_6, %c0_7, %c0_8], %35 {strides = array<i32>} : memref<1x4x256xf32, #tpu.memory_space<vmem>>, vector<1x4x256xf32>,
    return
  }
  func.func @transform_0(%arg0: i32, %arg1: i32) -> (i32, i32, i32) {
    %c0_i32 = arith.constant 0 : i32
    %c0_i32_0 = arith.constant 0 : i32
    return %arg0, %c0_i32, %arg1 : i32, i32, i32
  }
  func.func @transform_1(%arg0: i32, %arg1: i32) -> (i32, i32) {
    %c0_i32 = arith.constant 0 : i32
    %c0_i32_0 = arith.constant 0 : i32
    %c0_i32_1 = arith.constant 0 : i32
    return %c0_i32, %c0_i32_0 : i32, i32
  }
  func.func @transform_2(%arg0: i32, %arg1: i32) -> (i32, i32) {
    %c0_i32 = arith.constant 0 : i32
    %c0_i32_0 = arith.constant 0 : i32
    %c0_i32_1 = arith.constant 0 : i32
    return %c0_i32, %c0_i32_0 : i32, i32
  }
  func.func @transform_3(%arg0: i32, %arg1: i32) -> (i32, i32, i32) {
    %c0_i32 = arith.constant 0 : i32
    %c0_i32_0 = arith.constant 0 : i32
    return %arg0, %c0_i32, %arg1 : i32, i32, i32
  }
}

</mosaic_0001>

<bundles_post_ra>
// kernel: tpu_custom_call.1
= control target key start
LH: loop header
LB: loop body
LE: loop exit
PB: predicated region body
PF: predicated region fallthrough
CT: control target
= control target key end

     0   :  { %8 = vsyncpa [#allocation3], 0  ;;  %s879_s0 = inlined_call_operand.hbm [shape: bf16[2,4,256], index: 0, kind: input, shape index: {}]   ;;  %s880_s1 = inlined_call_operand.vmem [shape: bf16[4,4], index: 1, kind: input, shape index: {}]   ;;  %s881_s2 = inlined_call_operand.vmem [shape: f32[4,1], index: 2, kind: input, shape index: {}]   ;;  %s882_s3 = inlined_call_operand.hbm [shape: f32[2,4,256], index: 3, kind: output, shape index: {}]  }
   0x1   :  { %10 = vsyncpa [#allocation3 + $0x1], 0 }
   0x2   :  { %11 = vsyncpa [#allocation4], 0 }
   0x3   :  { %13 = vsyncpa [#allocation4 + $0x1], 0  ;;  %s700_s12 = smov 0   ;;  %s702_s13 = smov 0  }
   0x4   :  { %s704_s14 = smov 0   ;;  %s706_s15 = smov 0  }
   0x5   :  { %s708_s16 = smov 0   ;;  %s710_s17 = smov 0  }
   0x6 LB: > { %s469_s18 = sadd.s32 4294967295, %s671_s17   ;;  %s470_s19 = sadd.s32 4294967294, %s671_s17   ;;  %s671_s17 = sphi %s710_s17, %s19_s17   ;;  %s667_s16 = sphi %s708_s16, %s898_s16   ;;  %s663_s15 = sphi %s706_s15, %s897_s15   ;;  %s659_s14 = sphi %s704_s14, %s896_s14   ;;  %s655_s13 = sphi %s702_s13, %s895_s13   ;;  %s651_s12 = sphi %s700_s12, %s894_s12  }
   0x7   : > { %s31_s20 = sadd.s32 1, %s667_s16  ;;  %s40_s21 = sadd.s32 1, %s659_s14 }
   0x8   : > { %p33_p0 = scmp.ge.s32.totalorder %s31_s20, 2  ;;  %p47_p1 = scmp.ne.s32.totalorder %s659_s14, %s655_s13 }
   0x9   : > { %p48_p2 = scmp.eq.s32.totalorder %s671_s17, 0  ;;  %p53_p3 = scmp.ne.s32.totalorder %s655_s13, %s651_s12 }
   0xa   : > { %s900_s20 = smov (%p33_p0, %s31_s20), 0  ;;  %p54_p5 = scmp.eq.s32.totalorder %s469_s18, 0 }
   0xb   : > { %p741_p4 = por %p48_p2, %p47_p1  ;;  %s35_s23 = ssub.s32 %s667_s16, %s900_s20 }
   0xc   : > { %p121_p6 = scmp.eq.s32.totalorder %s469_s18, 1  ;;  %p38_p7 = scmp.eq.s32.totalorder %s35_s23, 0 }
   0xd   : > { %p747_p8 = por %p54_p5, %p53_p3  ;;  %p127_p10 = scmp.eq.s32.totalorder %s470_s19, 1 }
   0xe   : > { %p751_p9 = por %p121_p6, %p47_p1  ;;  %p498_p13 = scmp.lt.s32.totalorder %s671_s17, 2 }
   0xf   : > { %s756_s26 = scalar_select %p38_p7, %s659_s14, %s40_s21  }
  0x10   : > { %s886_s25 = scalar_select %p751_p9, 1, 0 }
  0x11   : > { %p758_p11 = por %p127_p10, %p53_p3  ;;  %s153_s28 = sand.u32 1, %s659_s14  }
  0x12   : > { %s473_s29 = sshll.u32 %s153_s28, 2  ;;  %s484_s30 = sshll.u32 %s667_s16, 6 }
  0x13   : > { %s887_s27 = scalar_select %p758_p11, 1, 0 }
  0x14   : > { %s769_s6 = scalar_lea.hbm %s879_s0, %s484_s30  ;;  %s157_s7 = scalar_lea.vmem [#allocation2], %s473_s29 }
  0x15   : > { %s167_s8 = sshll.u32 %s157_s7, 4  ;;  %p775_p0 = pnand %p498_p13, %p741_p4  ;;  %s771_s8 = int_to_ptr.vmem [resolvable:$true] %s167_s8 }
  0x16   : > { %s154_s10 = scalar_lea.sflag [#allocation3], %s153_s28  ;;  %s559_s11 = scalar_lea.hbm %s769_s6, 64 }
  0x17   : > { %p560_p3 = scmp.ne.s32.totalorder %s769_s6, %s559_s11  ;;  %p561_p5 = pneg %p775_p0 }
  0x18   : > { %s564_s21 = scalar_lea.hbm %s879_s0, 128  ;;  %p565_p4 = scmp.lt.u32.totalorder %s769_s6, %s879_s0 }
  0x19   : > { %p562_p6 = pnand %p561_p5, %p560_p3  ;;  %p566_p10 = scmp.lt.u32.totalorder %s564_s21, %s559_s11 }
  0x1a   : > { %p568_p12 = scmp.lt.u32.totalorder %s559_s11, %s769_s6 }
  0x1b   : > { %p563_p7 = pneg %p562_p6  ;;  %p567_p13 = por %p566_p10, %p565_p4 }
  0x1d   : > { %p569_p1 = por %p568_p12, %p567_p13 }
  0x1f   : > { %p570_p2 = pnand %p569_p1, %p563_p7 }
  0x21   : > { %573 = shalt.err (!%p570_p2)
}
  0x22   : > { %s574_s28 = scalar_lea.vmem %s771_s8, 64  ;;  %s673_s29 = smov [#allocation2]  }
  0x23   : > { %p575_p3 = scmp.ne.s32.totalorder %s771_s8, %s574_s28  ;;  %s579_s30 = sshll.u32 %s673_s29, 4  ;;  %s580_s30 = int_to_ptr.vmem [resolvable:$false] %s579_s30 }
  0x24   : > { %s581_s4 = scalar_lea.vmem %s580_s30, 128  ;;  %p582_p9 = scmp.lt.s32.totalorder %s771_s8, %s580_s30 }
  0x25   : > { %p577_p6 = pnand %p575_p3, %p561_p5  ;;  %p583_p4 = scmp.lt.s32.totalorder %s581_s4, %s574_s28 }
  0x27   : > { %p578_p11 = pneg %p577_p6  ;;  %p584_p10 = por %p583_p4, %p582_p9 }
  0x29   : > { %p585_p12 = pnand %p584_p10, %p578_p11 }
  0x2b   : > { %588 = shalt.err (!%p585_p12)
}
  0x2c   : > { %493 = dma.hbm_to_vmem [thread:$0]  (!%p775_p0), %s769_s6, 64, %s771_s8, %s154_s10  }
  0x2d   : > { %p889_p1 = scmp.lt.s32.totalorder %s671_s17, 3  ;;  %p890_p2 = scmp.ge.s32.totalorder %s671_s17, 1 }
  0x2f   : > { %p173_p5 = pnand %p890_p2, %p889_p1 }
  0x30   : > { %s811_s5 = sand.u32 (!%p173_p5), 1, %s655_s13  }
  0x31   : > { %176 = sbr.rel (%p173_p5) target bundleno = 221 (0xdd), region = 32  ;;  %s477_s7 = sshll.u32 (!%p173_p5), %s811_s5, 2 }
  0x32   : > { %s179_s11 = scalar_lea.sflag (!%p173_p5), [#allocation3], %s811_s5  ;;  %s182_s18 = scalar_lea.vmem (!%p173_p5), [#allocation2], %s477_s7 }
  0x38   : > { %642 = dma.done.wait (%p747_p8), %s179_s11, 64  }
  0x39   : > { %644 = vsyncadd (%p747_p8), %s179_s11, 4294967232  ;;  %v674_v0 = vmov 0   ;;  %v675_v1 = vmov 2   ;;  %v209_v2 = vld [vmem:[%s880_s1] sm:$0x3]  ;;  %v676_v4 = vmov 1   ;;  %v219_v7 = vlaneseq }
  0x3a   : > { %553 = vset.pattern.permute.xlu0 %v674_v0  ;;  %555 = vset.pattern.permute.xlu1 %v675_v1  ;;  %v210_v3 = vunpack.c.l.bf16 %v209_v2  ;;  %v677_v5 = vmov 3   ;;  %v352_v6 = vld [vmem:[%s881_s2] sm:$0xf]  ;;  %v678_v10 = vmov 839922192   ;;  %s478_s10 = sshll.u32 %s811_s5, 3 }
  0x3b   : > { %v220_v8 = vshrl.u32 %v219_v7, 7  ;;  %v207_v9 = vld [vmem:[%s182_s18] sm:$0xf]  ;;  %v217_v11 = vunpack.c.l.s4 %v678_v10  ;;  %s485_s19 = sshll.u32 %s663_s15, 7  ;;  %s204_s21 = scalar_lea.vmem [#allocation5], %s478_s10 }
  0x3c   : > { %213 = vperm.xlu0 %553, %v210_v3   ;;  %283 = vperm.xlu1 %555, %v210_v3   ;;  %v208_v14 = vunpack.c.l.bf16 %v207_v9  ;;  %s385_s22 = sshll.u32 %s204_s21, 4  ;;  %s830_s29 = scalar_lea.hbm %s882_s3, %s485_s19  ;;  %s832_s22 = int_to_ptr.vmem [resolvable:$true] %s385_s22 }
  0x3d   : > { %v226_v12 = vsub.s32 0, %v220_v8  ;;  %v230_v13 = vsub.s32 4, %v220_v8  ;;  %v260_v15 = vsub.s32 1, %v220_v8  ;;  %v264_v16 = vsub.s32 5, %v220_v8  ;;  %s369_s30 = scalar_lea.sflag [#allocation4], %s811_s5  ;;  %s589_s4 = scalar_lea.vmem %s832_s22, 128 }
  0x3e   : > { %v295_v17 = vsub.s32 2, %v220_v8  ;;  %v299_v18 = vsub.s32 6, %v220_v8  ;;  %v330_v19 = vsub.s32 3, %v220_v8  ;;  %v334_v20 = vsub.s32 7, %v220_v8  ;;  %p590_p8 = scmp.ne.s32.totalorder %s832_s22, %s589_s4  ;;  %p891_p9 = scmp.ne.s32.totalorder %s886_s25, 0 }
  0x3f   : > { %v218_v21 = vunpack.c.0.s8 %v217_v11  ;;  %v227_v22 = vrot.slane %v208_v14, %v226_v12  ;;  %v231_v23 = vrot.slane %v208_v14, %v230_v13  ;;  %v261_v24 = vrot.slane %v208_v14, %v260_v15  ;;  %s679_s15 = smov [#allocation5]  }
  0x40   : > { %554 = vset.pattern.permute.xlu0 %v676_v4  ;;  %556 = vset.pattern.permute.xlu1 %v677_v5  ;;  %v265_v25 = vrot.slane %v208_v14, %v264_v16  ;;  %v296_v26 = vrot.slane %v208_v14, %v295_v17  ;;  %v300_v27 = vrot.slane %v208_v14, %v299_v18  ;;  %p591_p11 = pnand %p590_p8, %p891_p9  ;;  %s593_s7 = sshll.u32 %s679_s15, 4  ;;  %s594_s7 = int_to_ptr.vmem [resolvable:$false] %s593_s7 }
  0x41   : > { %248 = vperm.xlu0 %554, %v210_v3   ;;  %318 = vperm.xlu1 %556, %v210_v3   ;;  %v331_v28 = vrot.slane %v208_v14, %v330_v19  ;;  %v335_v29 = vrot.slane %v208_v14, %v334_v20  ;;  %v221_v30 = vsub.s32 %v218_v21, %v220_v8  ;;  %s595_s11 = scalar_lea.vmem %s594_s7, 256  ;;  %p596_p7 = scmp.lt.s32.totalorder %s832_s22, %s594_s7 }
  0x42   : > { %v237_v32 = vrot.slane %v227_v22, %v226_v12  ;;  %v241_v33 = vrot.slane %v231_v23, %v226_v12  ;;  %v271_v35 = vrot.slane %v261_v24, %v260_v15  ;;  %v275_v36 = vrot.slane %v265_v25, %v260_v15  ;;  %p592_p0 = pneg %p591_p11  ;;  %p597_p13 = scmp.lt.s32.totalorder %s595_s11, %s589_s4 }
  0x43   : > { %v306_v37 = vrot.slane %v296_v26, %v295_v17  ;;  %v310_v38 = vrot.slane %v300_v27, %v295_v17  ;;  %v341_v39 = vrot.slane %v331_v28, %v330_v19  ;;  %v345_v40 = vrot.slane %v335_v29, %v330_v19 }
  0x44   : > { %v244_v42 = vcombine.low %v237_v32, %v241_v33  ;;  %v278_v43 = vcombine.low %v271_v35, %v275_v36  ;;  %p598_p3 = por %p597_p13, %p596_p7 }
  0x45   : > { %557 = vset.pattern.permute.xlu1 %v674_v0  ;;  %558 = vset.pattern.permute.xlu0 %v674_v0  ;;  %v313_v44 = vcombine.low %v306_v37, %v310_v38  ;;  %v348_v50 = vcombine.low %v341_v39, %v345_v40 }
  0x46   : > { %355 = vperm.xlu1 %557, %v352_v6   ;;  %p599_p6 = pnand %p598_p3, %p592_p0 }
  0xbb   : > { %v214_v31 = vpop.permute.xlu0 %213  ;;  %v284_v34 = vpop.permute.xlu1 %283 }
  0xbc   : > { %v222_v41 = vrot.slane %v214_v31, %v221_v30  ;;  %v292_v47 = vrot.slane %v284_v34, %v221_v30 }
  0xbe   : > { %v246_v51 = vmul.f32 %v244_v42, %v222_v41  ;;  %v315_v53 = vmul.f32 %v313_v44, %v292_v47 }
  0xc0   : > { %v249_v45 = vpop.permute.xlu0 %248  ;;  %v319_v46 = vpop.permute.xlu1 %318 }
  0xc1   : > { %v257_v48 = vrot.slane %v249_v45, %v221_v30  ;;  %v327_v49 = vrot.slane %v319_v46, %v221_v30 }
  0xc3   : > { %v280_v52 = vmul.f32 %v278_v43, %v257_v48  ;;  %v350_v55 = vmul.f32 %v348_v50, %v327_v49 }
  0xc5   : > { %v281_v54 = vadd.f32 %v280_v52, %v246_v51  ;;  %v356_v56 = vpop.permute.xlu1 %355 }
  0xc6   : > { %v363_v58 = vrot.slane %v356_v56, %v221_v30 }
  0xc7   : > { %v316_v57 = vadd.f32 %v315_v53, %v281_v54 }
  0xc9   : > { %v351_v59 = vadd.f32 %v350_v55, %v316_v57 }
  0xcb   : > { %v365_v60 = vadd.f32 %v363_v58, %v351_v59 }
  0xcd   : > { %v366_v61 = vmax.f32 %v365_v60, 0.0 }
  0xcf   : > { %367 = vst [vmem:[%s204_s21] sm:$0xff] %v366_v61 }
  0xd0   : > { %602 = shalt.err (!%p599_p6)
}
  0xd1   : > { %s603_s5 = scalar_lea.hbm %s830_s29, 128  ;;  %s607_s8 = scalar_lea.hbm %s882_s3, 256 }
  0xd2   : > { %p604_p4 = scmp.ne.s32.totalorder %s830_s29, %s603_s5  ;;  %p608_p1 = scmp.lt.u32.totalorder %s830_s29, %s882_s3 }
  0xd3   : > { %p609_p2 = scmp.lt.u32.totalorder %s607_s8, %s603_s5  ;;  %p611_p8 = scmp.lt.u32.totalorder %s603_s5, %s830_s29 }
  0xd4   : > { %p605_p10 = pnand %p604_p4, %p891_p9 }
  0xd5   : > { %p610_p5 = por %p609_p2, %p608_p1 }
  0xd6   : > { %p606_p12 = pneg %p605_p10 }
  0xd7   : > { %p612_p11 = por %p611_p8, %p610_p5 }
  0xd9   : > { %p613_p0 = pnand %p612_p11, %p606_p12 }
  0xdb   : > { %616 = shalt.err (!%p613_p0)
}
  0xdc   : > { %488 = dma.vmem_to_hbm [thread:$0]  (%p891_p9), %s832_s22, 128, %s830_s29, %s369_s30  }
  0xdd PF: > { %s397_s10 = sand.u32 1, %s651_s12   ;;  %p892_p7 = scmp.ne.s32.totalorder %s887_s27, 0 }
  0xde   : > { %p893_p13 = scmp.ge.s32.totalorder %s671_s17, 2  ;;  %s398_s19 = scalar_lea.sflag [#allocation4], %s397_s10 }
  0xe0   : > { %p495_p3 = pnand %p893_p13, %p892_p7 }
  0xe2   : > { %646 = dma.done.wait (!%p495_p3), %s398_s19, 128  }
  0xe3   : > { %648 = vsyncadd (!%p495_p3), %s398_s19, 4294967168  ;;  %s19_s17 = sadd.s32 1, %s671_s17   ;;  %s894_s12 = smov %s655_s13 }
  0xe4   : > { %p16_p6 = scmp.ge.s32.totalorder %s19_s17, 4   ;;  %s895_s13 = smov %s659_s14 }
  0xe5   : > { %s896_s14 = smov %s756_s26  ;;  %s897_s15 = smov %s667_s16 }
  0xe6   : > { %s898_s16 = smov %s900_s20  ;;  %18 = sbr.rel (!%p16_p6) target bundleno = 6 (0x6), region = 77 }
  0xed   :  { %403 = vsyncpa [#allocation3], 1 }
  0xee   :  { %405 = vsyncpa [#allocation3 + $0x1], 1 }
  0xef   :  { %406 = vsyncpa [#allocation4], 1 }
  0xf0   :  { %408 = vsyncpa [#allocation4 + $0x1], 1 }

</bundles_post_ra>
